<compile_context>
chip_gen: v7x
topology: tpu7x:2x2x1
jax: 0.10.0
libtpu: 0.0.40
codegen_flags: <defaults>
</compile_context>

<pallas_src>
import functools

import jax
import jax.numpy as jnp
from jax.experimental import pallas as pl
from jax.experimental.pallas import tpu as pltpu


def _round_up(a, b):
    return (a + b - 1) // b * b


def _tile_budget():
    """(tm cap, scoped-VMEM budget) per TPU generation; conservative default."""
    try:
        kind = jax.devices()[0].device_kind.lower()
    except Exception:
        kind = ""
    if "v5" in kind or "v6" in kind:          # 128 MiB physical VMEM
        return 1024, 64 * 1024 * 1024
    return 512, 40 * 1024 * 1024               # v7x (64 MiB physical) / unknown


# ----------------------------------------------------------------------------
# Pass 1: per-M-tile conv matmul (full K in one MXU shot) + per-tile partial
# per-channel sum / sum-of-squares.  grid = (n_m,), fully parallel.
# ----------------------------------------------------------------------------
def _conv_stats_kernel(p_ref, w_ref, conv_ref, stats_ref):
    # bf16 x bf16 -> f32 on the MXU; accumulator stays in registers.
    acc = jnp.dot(p_ref[...], w_ref[...], preferred_element_type=jnp.float32)
    # bf16 intermediate write-back (stats are taken from the f32 acc first).
    conv_ref[...] = acc.astype(conv_ref.dtype)
    s = jnp.sum(acc, axis=0, keepdims=True)
    sq = jnp.sum(acc * acc, axis=0, keepdims=True)
    pad = jnp.zeros((stats_ref.shape[0] - 2, stats_ref.shape[1]), jnp.float32)
    stats_ref[...] = jnp.concatenate([s, sq, pad], axis=0)


# ----------------------------------------------------------------------------
# Pass 2: fused BatchNorm (precomputed scale/shift) + activation, tiled over M.
# ----------------------------------------------------------------------------
def _bn_act_kernel(conv_ref, scale_ref, shift_ref, o_ref, *, act):
    y = conv_ref[...].astype(jnp.float32) * scale_ref[...] + shift_ref[...]
    if act == "relu":
        y = jnp.maximum(y, 0.0)
    else:  # LeakyReLU(0.2)
        y = jnp.where(y > 0.0, y, 0.2 * y)
    o_ref[...] = y.astype(o_ref.dtype)


# ----------------------------------------------------------------------------
# im2col (wrapper side), bf16, padded to (m_p, k_p) in one step.
# Row order (n, oh, ow); column order (c, kh, kw) matching Conv2d weight flatten.
# ----------------------------------------------------------------------------
def _im2col_padded(x_bf16, m_pad, k_pad, k=4, stride=2, pad=1):
    N, C, H, W = x_bf16.shape
    xp = jnp.pad(x_bf16, ((0, 0), (0, 0), (pad, pad), (pad, pad)))
    Ho = (H + 2 * pad - k) // stride + 1
    Wo = (W + 2 * pad - k) // stride + 1
    cols = []
    for kh in range(k):
        for kw in range(k):
            cols.append(xp[:, :, kh:kh + stride * Ho:stride,
                           kw:kw + stride * Wo:stride])
    patches = jnp.stack(cols, axis=0).reshape(k, k, N, C, Ho, Wo)
    patches = patches.transpose(2, 4, 5, 3, 0, 1)          # [N, Ho, Wo, C, kh, kw]
    patches = patches.reshape(N * Ho * Wo, C * k * k)
    return jnp.pad(patches, ((0, m_pad), (0, k_pad)))


def unet_block_forward(x, weight, gamma, beta, *, down=True, act="relu",
                       dropout=False, eps=1e-5, out_layout="NCHW"):
    """x: [N, in_ch, H, W] (NCHW), weight: [out_ch, in_ch, 4, 4] (OIHW)."""
    assert down, "only down=True (Conv2d) path implemented"
    assert not dropout, "Dropout(0.5) path not implemented (Identity only)"

    N, Cin, H, W = x.shape
    Cout = weight.shape[0]
    Ho = (H + 2 - 4) // 2 + 1
    Wo = (W + 2 - 4) // 2 + 1
    M = N * Ho * Wo
    K = Cin * 16

    # Lane-dense / aligned padded sizes.
    cout_p = _round_up(Cout, 128)
    k_p = _round_up(K, 128)
    assert k_p <= 8192, "single-K-step path only (Cin*16 <= 8192)"

    # Tile selection against the per-generation scoped-VMEM budget.
    tm_cap, vmem_budget = _tile_budget()
    tm = tm_cap if M >= tm_cap else _round_up(M, 8)

    def _working_set(tm_):  # 2 bufs each: patches, weight, bf16 conv out (+stats)
        return (2 * (tm_ * k_p * 2 + k_p * cout_p * 2 + tm_ * cout_p * 2)
                + 2 * 8 * cout_p * 4)

    while tm > 256 and _working_set(tm) > vmem_budget:
        tm //= 2
    m_p = _round_up(M, tm)
    n_m = m_p // tm

    # bf16 MXU operands, zero-padded (padded rows/cols contribute exactly zero,
    # including to the channel statistics; true divisor M is used below).
    p_pad = _im2col_padded(x.astype(jnp.bfloat16), m_p - M, k_p - K)
    w_mat = weight.reshape(Cout, K).T.astype(jnp.bfloat16)            # [K, Cout]
    w_pad = jnp.pad(w_mat, ((0, k_p - K), (0, cout_p - Cout)))

    cparams = pltpu.CompilerParams(
        dimension_semantics=("parallel",),
        vmem_limit_bytes=vmem_budget)

    # ---- Pass 1: conv tiles (bf16) + per-tile partial channel statistics. ----
    conv_bf16, stats = pl.pallas_call(
        _conv_stats_kernel,
        out_shape=(jax.ShapeDtypeStruct((m_p, cout_p), jnp.bfloat16),
                   jax.ShapeDtypeStruct((n_m * 8, cout_p), jnp.float32)),
        grid_spec=pltpu.PrefetchScalarGridSpec(
            num_scalar_prefetch=0,
            grid=(n_m,),
            in_specs=[
                pl.BlockSpec((tm, k_p), lambda i: (i, 0)),         # patches
                pl.BlockSpec((k_p, cout_p), lambda i: (0, 0)),     # weights (resident)
            ],
            out_specs=(
                pl.BlockSpec((tm, cout_p), lambda i: (i, 0)),      # conv (bf16)
                pl.BlockSpec((8, cout_p), lambda i: (i, 0)),       # [sum; ssq; 0...]
            )),
        compiler_params=cparams,
        cost_estimate=pl.CostEstimate(
            flops=2 * m_p * k_p * cout_p,
            transcendentals=0,
            bytes_accessed=(m_p * k_p * 2 + k_p * cout_p * 2
                            + m_p * cout_p * 2 + n_m * 8 * cout_p * 4)),
    )(p_pad, w_pad)

    # ---- Fold BatchNorm (training stats) into per-channel scale/shift. ----
    stats = stats.reshape(n_m, 8, cout_p)
    ch_sum = jnp.sum(stats[:, 0, :], axis=0)
    ch_ssq = jnp.sum(stats[:, 1, :], axis=0)
    inv_m = 1.0 / float(M)
    mean = ch_sum * inv_m
    var = jnp.maximum(ch_ssq * inv_m - mean * mean, 0.0)   # clamp cancellation
    inv_std = jax.lax.rsqrt(var + eps)
    gamma_p = jnp.pad(gamma.astype(jnp.float32), (0, cout_p - Cout))
    beta_p = jnp.pad(beta.astype(jnp.float32), (0, cout_p - Cout))
    scale = (gamma_p * inv_std).reshape(1, cout_p)
    shift = (beta_p - mean * gamma_p * inv_std).reshape(1, cout_p)

    # ---- Pass 2: y = conv * scale + shift, activation. ----
    out_pad = pl.pallas_call(
        functools.partial(_bn_act_kernel, act=act),
        out_shape=jax.ShapeDtypeStruct((m_p, cout_p), jnp.float32),
        grid_spec=pltpu.PrefetchScalarGridSpec(
            num_scalar_prefetch=0,
            grid=(n_m,),
            in_specs=[
                pl.BlockSpec((tm, cout_p), lambda i: (i, 0)),   # conv tile (bf16)
                pl.BlockSpec((1, cout_p), lambda i: (0, 0)),    # scale
                pl.BlockSpec((1, cout_p), lambda i: (0, 0)),    # shift
            ],
            out_specs=pl.BlockSpec((tm, cout_p), lambda i: (i, 0))),
        compiler_params=cparams,
    )(conv_bf16, scale, shift)

    # Strip padding; NHWC is the natural lane-dense layout.  Module contract is
    # NCHW, so transpose by default (pass out_layout="NHWC" to skip it when
    # chaining blocks).
    out = out_pad[:M, :Cout].reshape(N, Ho, Wo, Cout)
    if out_layout == "NCHW":
        out = out.transpose(0, 3, 1, 2)
    return out


# ----------------------------------------------------------------------------
# Pure-JAX reference (mirrors bf16 MXU operands and the bf16 conv intermediate).
# ----------------------------------------------------------------------------
def _reference(x, weight, gamma, beta, act="relu", eps=1e-5):
    xb = x.astype(jnp.bfloat16).astype(jnp.float32)
    wb = weight.astype(jnp.bfloat16).astype(jnp.float32)
    conv = jax.lax.conv_general_dilated(
        xb, wb, window_strides=(2, 2), padding=((1, 1), (1, 1)),
        dimension_numbers=("NCHW", "OIHW", "NCHW"),
        precision=jax.lax.Precision.HIGHEST)
    mean = conv.mean(axis=(0, 2, 3), keepdims=True)
    var = ((conv - mean) ** 2).mean(axis=(0, 2, 3), keepdims=True)
    conv_q = conv.astype(jnp.bfloat16).astype(jnp.float32)   # bf16 intermediate
    y = (conv_q - mean) * jax.lax.rsqrt(var + eps)
    y = y * gamma.reshape(1, -1, 1, 1) + beta.reshape(1, -1, 1, 1)
    return jnp.maximum(y, 0.0) if act == "relu" else jnp.where(y > 0, y, 0.2 * y)


if __name__ == "__main__":
    # Small shapes consistent with the module: UNetBlock(in_ch=4, out_ch=8).
    N, Cin, Cout, H, W = 2, 4, 8, 16, 16
    key = jax.random.PRNGKey(0)
    kx, kw = jax.random.split(key)

    x = jax.random.normal(kx, (N, Cin, H, W), dtype=jnp.float32)
    # Conv2d(4, 8, 4, 2, 1, bias=False) weight, BatchNorm2d default affine init.
    weight = jax.random.normal(kw, (Cout, Cin, 4, 4), dtype=jnp.float32) * 0.1
    gamma = jnp.ones((Cout,), jnp.float32)
    beta = jnp.zeros((Cout,), jnp.float32)

    ok = True
    for act in ("relu", "leaky"):
        out = unet_block_forward(x, weight, gamma, beta,
                                 down=True, act=act, dropout=False)
        out = jax.block_until_ready(out)
        ref = _reference(x, weight, gamma, beta, act=act)
        assert out.shape == (N, Cout, H // 2, W // 2), out.shape
        err = jnp.abs(out - ref)
        # bf16 intermediate / MXU accumulation-order tolerance.
        ok &= bool(jnp.allclose(out, ref, atol=2e-2, rtol=2e-2))
        ok &= bool(err.mean() < 1e-3)
        assert ok, (act, float(err.max()), float(err.mean()))

    print("KERNEL_OK")
</pallas_src>

<mosaic_0001>
module attributes {stable_mosaic.version = 11 : i64} {
  func.func @_conv_stats_kernel(%arg0: i32, %arg1: memref<128x128xbf16, #tpu.memory_space<vmem>>, %arg2: memref<128x128xbf16, #tpu.memory_space<vmem>>, %arg3: memref<128x128xbf16, #tpu.memory_space<vmem>>, %arg4: memref<8x128xf32, #tpu.memory_space<vmem>>) attributes {dimension_semantics = [#tpu.dimension_semantics<parallel>], iteration_bounds = array<i64: 1>, scalar_prefetch = 0 : i64, scratch_operands = 0 : i64, tpu.core_type = #tpu.core_type<tc>, window_params = [{transform_indices = @transform_0, window_bounds = array<i64: 128, 128>}, {pipeline_mode = #tpu.pipeline_mode<synchronous>, transform_indices = @transform_1, window_bounds = array<i64: 128, 128>}, {transform_indices = @transform_2, window_bounds = array<i64: 128, 128>}, {transform_indices = @transform_3, window_bounds = array<i64: 8, 128>}]} {
    %c0 = arith.constant 0 : index
    %c0_0 = arith.constant 0 : index
    %0 = vector.load %arg1[%c0, %c0_0] : memref<128x128xbf16, #tpu.memory_space<vmem>>, vector<128x128xbf16>
    %c0_1 = arith.constant 0 : index
    %c0_2 = arith.constant 0 : index
    %1 = vector.load %arg2[%c0_1, %c0_2] : memref<128x128xbf16, #tpu.memory_space<vmem>>, vector<128x128xbf16>
    %cst = arith.constant dense<0.000000e+00> : vector<128x128xf32>
    %2 = tpu.matmul %0, %1, %cst {dimension_numbers = #tpu.dot_dimension_numbers<[1], [0], [0], [1], [0, 0, 1, 1], [], []>} : vector<128x128xbf16>, vector<128x128xbf16>, vector<128x128xf32> -> vector<128x128xf32>
    %3 = arith.truncf %2 : vector<128x128xf32> to vector<128x128xbf16>
    %c0_3 = arith.constant 0 : index
    %c0_4 = arith.constant 0 : index
    %4 = vector.load %arg3[%c0_3, %c0_4] : memref<128x128xbf16, #tpu.memory_space<vmem>>, vector<128x128xbf16>
    tpu.vector_store %arg3[%c0_3, %c0_4], %3 {strides = array<i32>} : memref<128x128xbf16, #tpu.memory_space<vmem>>, vector<128x128xbf16>,
    %cst_5 = arith.constant dense<0.000000e+00> : vector<128xf32>
    %5 = vector.multi_reduction <add>, %2, %cst_5 [0] : vector<128x128xf32> to vector<128xf32>
    %6 = vector.shape_cast %5 : vector<128xf32> to vector<1x128xf32>
    %7 = arith.mulf %2, %2 : vector<128x128xf32>
    %cst_6 = arith.constant dense<0.000000e+00> : vector<128xf32>
    %8 = vector.multi_reduction <add>, %7, %cst_6 [0] : vector<128x128xf32> to vector<128xf32>
    %9 = vector.shape_cast %8 : vector<128xf32> to vector<1x128xf32>
    %cst_7 = arith.constant 0.000000e+00 : f32
    %10 = vector.broadcast %cst_7 : f32 to vector<6x128xf32>
    %11 = tpu.concatenate %6, %9, %10 in 0 : vector<1x128xf32>, vector<1x128xf32>, vector<6x128xf32> -> vector<8x128xf32>
    %c0_8 = arith.constant 0 : index
    %c0_9 = arith.constant 0 : index
    %12 = vector.load %arg4[%c0_8, %c0_9] : memref<8x128xf32, #tpu.memory_space<vmem>>, vector<8x128xf32>
    tpu.vector_store %arg4[%c0_8, %c0_9], %11 {strides = array<i32>} : memref<8x128xf32, #tpu.memory_space<vmem>>, vector<8x128xf32>,
    return
  }
  func.func @transform_0(%arg0: i32) -> (i32, i32) {
    %c0_i32 = arith.constant 0 : i32
    %c0_i32_0 = arith.constant 0 : i32
    return %arg0, %c0_i32 : i32, i32
  }
  func.func @transform_1(%arg0: i32) -> (i32, i32) {
    %c0_i32 = arith.constant 0 : i32
    %c0_i32_0 = arith.constant 0 : i32
    %c0_i32_1 = arith.constant 0 : i32
    return %c0_i32, %c0_i32_0 : i32, i32
  }
  func.func @transform_2(%arg0: i32) -> (i32, i32) {
    %c0_i32 = arith.constant 0 : i32
    %c0_i32_0 = arith.constant 0 : i32
    return %arg0, %c0_i32 : i32, i32
  }
  func.func @transform_3(%arg0: i32) -> (i32, i32) {
    %c0_i32 = arith.constant 0 : i32
    %c0_i32_0 = arith.constant 0 : i32
    return %arg0, %c0_i32 : i32, i32
  }
}

</mosaic_0001>

<bundles_post_ra>
// kernel: tpu_custom_call.1
= control target key start
LH: loop header
LB: loop body
LE: loop exit
PB: predicated region body
PF: predicated region fallthrough
CT: control target
= control target key end

     0   :  { %9 = vsyncpa [#allocation3], 0  ;;  %s828_s0 = inlined_call_operand.hbm [shape: bf16[128,128], index: 0, kind: input, shape index: {}]   ;;  %s829_s1 = inlined_call_operand.hbm [shape: bf16[128,128], index: 1, kind: input, shape index: {}]   ;;  %s830_s2 = inlined_call_operand.hbm [shape: bf16[128,128], index: 2, kind: output, shape index: {0}]   ;;  %s831_s3 = inlined_call_operand.hbm [shape: f32[8,128], index: 3, kind: output, shape index: {1}]  }
   0x1   :  { %10 = vsyncpa [#allocation6], 0 }
   0x2   :  { %11 = vsyncpa [#allocation4], 0 }
   0x3   :  { %12 = vsyncpa [#allocation9], 0  ;;  %s721_s12 = smov [#allocation2]   ;;  %s625_s16 = scalar_lea.hbm %s828_s0, 1024 }
   0x4   :  { %s18_s13 = sshll.u32 %s721_s12, 4  ;;  %p626_p0 = scmp.ne.s32.totalorder %s828_s0, %s625_s16  ;;  %s19_s13 = int_to_ptr.vmem [resolvable:$true] %s18_s13 }
   0x5   :  { %p629_p1 = scmp.lt.u32.totalorder %s625_s16, %s828_s0 }
   0x7   :  { %p631_p2 = pnand %p629_p1, %p626_p0 }
   0x9   :  { %634 = shalt.err (!%p631_p2)
}
   0xa   :  { %s635_s21 = scalar_lea.vmem %s19_s13, 1024  ;;  %p640_p4 = scmp.lt.s32.totalorder %s19_s13, %s19_s13 }
   0xb   :  { %p636_p3 = scmp.ne.s32.totalorder %s19_s13, %s635_s21  ;;  %p641_p5 = scmp.lt.s32.totalorder %s635_s21, %s635_s21 }
   0xd   :  { %p642_p6 = por %p641_p5, %p640_p4 }
   0xf   :  { %p643_p7 = pnand %p642_p6, %p636_p3 }
  0x11   :  { %646 = shalt.err (!%p643_p7)
}
  0x12   :  { %s722_s22 = smov 64   ;;  %s723_s23 = smov 4  }
  0x13   :  { %24 = dma.hbm_to_vmem [thread:$0]  %s828_s0, 1024, %s19_s13, [#allocation3], %s722_s22, %s722_s22, %s723_s23  }
  0x14   :  { %s724_s26 = smov [#allocation5]   ;;  %s647_s30 = scalar_lea.hbm %s829_s1, 1024 }
  0x15   :  { %s30_s27 = sshll.u32 %s724_s26, 4  ;;  %p648_p8 = scmp.ne.s32.totalorder %s829_s1, %s647_s30  ;;  %s31_s27 = int_to_ptr.vmem [resolvable:$true] %s30_s27 }
  0x16   :  { %p651_p9 = scmp.lt.u32.totalorder %s647_s30, %s829_s1 }
  0x18   :  { %p653_p10 = pnand %p651_p9, %p648_p8 }
  0x1a   :  { %656 = shalt.err (!%p653_p10)
}
  0x1b   :  { %s657_s8 = scalar_lea.vmem %s31_s27, 1024  ;;  %p662_p12 = scmp.lt.s32.totalorder %s31_s27, %s31_s27 }
  0x1c   :  { %p658_p11 = scmp.ne.s32.totalorder %s31_s27, %s657_s8  ;;  %p663_p13 = scmp.lt.s32.totalorder %s657_s8, %s657_s8 }
  0x1e   :  { %p664_p0 = por %p663_p13, %p662_p12 }
  0x20   :  { %p665_p1 = pnand %p664_p0, %p658_p11 }
  0x22   :  { %668 = shalt.err (!%p665_p1)
}
  0x23   :  { %36 = dma.hbm_to_vmem [thread:$0]  %s829_s1, 1024, %s31_s27, [#allocation6], %s722_s22, %s722_s22, %s723_s23  }
  0x24   :  { %713 = dma.done.wait [#allocation3], 1024  }
  0x25   :  { %714 = vsyncadd [#allocation3], 4294966272 }
  0x26   :  { %715 = dma.done.wait [#allocation6], 1024  }
  0x27   :  { %716 = vsyncadd [#allocation6], 4294966272  ;;  %v609_v0 = vld [vmem:[#allocation5] sm:$0xff]   ;;  %v610_v1 = vld [vmem:[#allocation5 + $0x8] sm:$0xff]   ;;  %s725_s1 = smov [#allocation7]  }
  0x28   :  { %555 = vmatprep.subr.bf16.mxu0 %v609_v0  ;;  %587 = vmatprep.subr.bf16.mxu1 %v609_v0  ;;  %v611_v2 = vld [vmem:[#allocation5 + $0x10] sm:$0xff]   ;;  %v612_v3 = vld [vmem:[#allocation5 + $0x18] sm:$0xff]   ;;  %v617_v4 = vld [vmem:[#allocation2] sm:$0xff]   ;;  %s417_s10 = sshll.u32 %s725_s1, 4  ;;  %s418_s10 = int_to_ptr.vmem [resolvable:$true] %s417_s10 }
  0x29   :  { %556 = vmatpush3.bf16.msra.mxu0 %v609_v0  ;;  %595 = vmatpush3.bf16.msra.mxu1 %v609_v0  ;;  %v613_v5 = vld [vmem:[#allocation5 + $0x20] sm:$0xff]   ;;  %v614_v7 = vld [vmem:[#allocation5 + $0x28] sm:$0xff]   ;;  %v615_v8 = vld [vmem:[#allocation5 + $0x30] sm:$0xff]   ;;  %s669_s11 = scalar_lea.vmem %s418_s10, 1024  ;;  %p674_p3 = scmp.lt.s32.totalorder %s418_s10, %s418_s10 }
  0x2a   :  { %557 = vmatprep.subr.bf16.mxu0 %v610_v1  ;;  %588 = vmatprep.subr.bf16.mxu1 %v610_v1  ;;  %v621_v6 = vld [vmem:[#allocation2 + $0x20] sm:$0xff]   ;;  %v616_v9 = vld [vmem:[#allocation5 + $0x38] sm:$0xff]   ;;  %v618_v10 = vld [vmem:[#allocation2 + $0x8] sm:$0xff]   ;;  %p670_p2 = scmp.ne.s32.totalorder %s418_s10, %s669_s11  ;;  %p675_p4 = scmp.lt.s32.totalorder %s669_s11, %s669_s11 }
  0x2b   :  { %571 = vmatprep.mubr.bf16.mxu0 %v617_v4  ;;  %579 = vmatprep.mubr.bf16.mxu1 %v621_v6  ;;  %v622_v11 = vld [vmem:[#allocation2 + $0x28] sm:$0xff]   ;;  %v619_v12 = vld [vmem:[#allocation2 + $0x10] sm:$0xff]   ;;  %v620_v14 = vld [vmem:[#allocation2 + $0x18] sm:$0xff]  }
  0x2c   :  { %v623_v13 = vld [vmem:[#allocation2 + $0x30] sm:$0xff]   ;;  %v624_v15 = vld [vmem:[#allocation2 + $0x38] sm:$0xff]   ;;  %p676_p5 = por %p675_p4, %p674_p3 }
  0x2d   :  { %558 = vmatpush3.bf16.msra.mxu0 %v610_v1  ;;  %596 = vmatpush3.bf16.msra.mxu1 %v610_v1 }
  0x2e   :  { %559 = vmatprep.subr.bf16.mxu0 %v611_v2  ;;  %589 = vmatprep.subr.bf16.mxu1 %v611_v2  ;;  %p677_p6 = pnand %p676_p5, %p670_p2 }
  0x31   :  { %560 = vmatpush3.bf16.msra.mxu0 %v611_v2  ;;  %597 = vmatpush3.bf16.msra.mxu1 %v611_v2 }
  0x32   :  { %561 = vmatprep.subr.bf16.mxu0 %v612_v3  ;;  %590 = vmatprep.subr.bf16.mxu1 %v612_v3 }
  0x35   :  { %562 = vmatpush3.bf16.msra.mxu0 %v612_v3  ;;  %598 = vmatpush3.bf16.msra.mxu1 %v612_v3 }
  0x36   :  { %563 = vmatprep.subr.bf16.mxu0 %v613_v5  ;;  %591 = vmatprep.subr.bf16.mxu1 %v613_v5 }
  0x39   :  { %564 = vmatpush3.bf16.msra.mxu0 %v613_v5  ;;  %599 = vmatpush3.bf16.msra.mxu1 %v613_v5 }
  0x3a   :  { %565 = vmatprep.subr.bf16.mxu0 %v614_v7  ;;  %592 = vmatprep.subr.bf16.mxu1 %v614_v7 }
  0x3d   :  { %566 = vmatpush3.bf16.msra.mxu0 %v614_v7  ;;  %600 = vmatpush3.bf16.msra.mxu1 %v614_v7 }
  0x3e   :  { %567 = vmatprep.subr.bf16.mxu0 %v615_v8  ;;  %593 = vmatprep.subr.bf16.mxu1 %v615_v8 }
  0x41   :  { %568 = vmatpush3.bf16.msra.mxu0 %v615_v8  ;;  %601 = vmatpush3.bf16.msra.mxu1 %v615_v8 }
  0x42   :  { %569 = vmatprep.subr.bf16.mxu0 %v616_v9  ;;  %594 = vmatprep.subr.bf16.mxu1 %v616_v9 }
  0x45   :  { %570 = vmatpush3.bf16.msra.mxu0 %v616_v9  ;;  %602 = vmatpush3.bf16.msra.mxu1 %v616_v9 }
  0x48   :  { %572 = vmatmul.mubr.bf16.vlgmr.msra.gmra.mrb[0].mxu0 %v618_v10  ;;  %580 = vmatmul.mubr.bf16.vlgmr.msra.gmra.mrb[0].mxu1 %v622_v11 }
  0x49   :  { %575 = vmatprep.mubr.bf16.mxu0 %v619_v12  ;;  %583 = vmatprep.mubr.bf16.mxu1 %v623_v13 }
  0x50   :  { %576 = vmatmul.mubr.bf16.gmra.mrb[4].mxu0 %v620_v14  ;;  %584 = vmatmul.mubr.bf16.gmra.mrb[4].mxu1 %v624_v15 }
 0x11b   :  { %v573_v16 = vpop.f32.mrb[0].mxu0  ;;  %v777_v17 = vpop.f32.mrb[0].mxu1 }
 0x11c   :  { %v206_v18 = vpop.f32.mrb[1].mxu0  ;;  %v779_v19 = vpop.f32.mrb[1].mxu1  ;;  %v372_v31 = vmul.f32 %v573_v16, %v573_v16 }
 0x11d   :  { %v574_v20 = vpop.f32.mrb[2].mxu0  ;;  %v781_v21 = vpop.f32.mrb[2].mxu1  ;;  %v370_v22 = vmul.f32 %v206_v18, %v206_v18  ;;  %v378_v61 = vmul.f32 %v779_v19, %v779_v19 }
 0x11e   :  { %v500_v23 = vpack.c.bf16 %v574_v20, %v573_v16  ;;  %v209_v24 = vpop.f32.mrb[3].mxu0  ;;  %v520_v25 = vpack.c.bf16 %v781_v21, %v777_v17  ;;  %v785_v26 = vpop.f32.mrb[3].mxu1  ;;  %v373_v34 = vmul.f32 %v574_v20, %v574_v20 }
 0x11f   :  { %v495_v27 = vpack.c.bf16 %v209_v24, %v206_v18  ;;  %v349_v28 = vadd.f32 %v209_v24, %v206_v18  ;;  %v371_v29 = vmul.f32 %v209_v24, %v209_v24  ;;  %v515_v30 = vpack.c.bf16 %v785_v26, %v779_v19 }
 0x120   :  { %532 = vst [vmem:[#allocation7 + $0x8] sm:$0xff] %v500_v23   ;;  %536 = vst [vmem:[#allocation7 + $0x28] sm:$0xff] %v520_v25  }
 0x121   :  { %496 = vst [vmem:[#allocation7] sm:$0xff] %v495_v27   ;;  %v350_v32 = vadd.f32 %v573_v16, %v349_v28  ;;  %v386_v33 = vadd.f32 %v371_v29, %v370_v22  ;;  %535 = vst [vmem:[#allocation7 + $0x20] sm:$0xff] %v515_v30  }
 0x123   :  { %v387_v35 = vadd.f32 %v386_v33, %v372_v31  ;;  %v577_v36 = vpop.f32.mrb[4].mxu0  ;;  %v351_v37 = vadd.f32 %v574_v20, %v350_v32  ;;  %v585_v38 = vpop.f32.mrb[4].mxu1 }
 0x124   :  { %v222_v39 = vpop.f32.mrb[5].mxu0  ;;  %v254_v40 = vpop.f32.mrb[5].mxu1  ;;  %v376_v55 = vmul.f32 %v577_v36, %v577_v36 }
 0x125   :  { %v352_v41 = vadd.f32 %v351_v37, %v222_v39  ;;  %v374_v42 = vmul.f32 %v222_v39, %v222_v39  ;;  %v388_v43 = vadd.f32 %v387_v35, %v373_v34  ;;  %v578_v44 = vpop.f32.mrb[6].mxu0  ;;  %v586_v45 = vpop.f32.mrb[6].mxu1 }
 0x126   :  { %v510_v46 = vpack.c.bf16 %v578_v44, %v577_v36  ;;  %v225_v47 = vpop.f32.mrb[7].mxu0  ;;  %v530_v48 = vpack.c.bf16 %v586_v45, %v585_v38  ;;  %v257_v49 = vpop.f32.mrb[7].mxu1  ;;  %v377_v58 = vmul.f32 %v578_v44, %v578_v44 }
 0x127   :  { %v389_v50 = vadd.f32 %v388_v43, %v374_v42  ;;  %v505_v51 = vpack.c.bf16 %v225_v47, %v222_v39  ;;  %v353_v52 = vadd.f32 %v352_v41, %v225_v47  ;;  %v375_v53 = vmul.f32 %v225_v47, %v225_v47 }
 0x128   :  { %534 = vst [vmem:[#allocation7 + $0x18] sm:$0xff] %v510_v46   ;;  %538 = vst [vmem:[#allocation7 + $0x38] sm:$0xff] %v530_v48   ;;  %v525_v54 = vpack.c.bf16 %v257_v49, %v254_v40 }
 0x129   :  { %533 = vst [vmem:[#allocation7 + $0x10] sm:$0xff] %v505_v51   ;;  %v354_v56 = vadd.f32 %v577_v36, %v353_v52  ;;  %v390_v57 = vadd.f32 %v389_v50, %v375_v53 }
 0x12a   :  { %537 = vst [vmem:[#allocation7 + $0x30] sm:$0xff] %v525_v54  }
 0x12b   :  { %v391_v59 = vadd.f32 %v390_v57, %v376_v55  ;;  %v355_v60 = vadd.f32 %v578_v44, %v354_v56 }
 0x12c   :  { %680 = shalt.err (!%p677_p6)
}
 0x12d   :  { %s681_s14 = scalar_lea.hbm %s830_s2, 1024 }
 0x12e   :  { %p682_p7 = scmp.ne.s32.totalorder %s830_s2, %s681_s14  ;;  %p685_p8 = scmp.lt.u32.totalorder %s681_s14, %s830_s2 }
 0x130   :  { %p687_p9 = pnand %p685_p8, %p682_p7 }
 0x132   :  { %690 = shalt.err (!%p687_p9)
}
 0x133   :  { %423 = dma.vmem_to_hbm [thread:$0]  %s418_s10, 1024, %s830_s2, [#allocation4], %s722_s22, %s722_s22, %s723_s23   ;;  %v356_v62 = vadd.f32 %v355_v60, %v779_v19  ;;  %v392_v63 = vadd.f32 %v391_v59, %v377_v58  ;;  %v379_v2 = vmul.f32 %v785_v26, %v785_v26  ;;  %v380_v3 = vmul.f32 %v777_v17, %v777_v17 }
 0x134   :  { %v381_v6 = vmul.f32 %v781_v21, %v781_v21  ;;  %v382_v9 = vmul.f32 %v254_v40, %v254_v40  ;;  %v383_v14 = vmul.f32 %v257_v49, %v257_v49  ;;  %v384_v15 = vmul.f32 %v585_v38, %v585_v38  ;;  %s726_s2 = smov [#allocation8]  }
 0x135   :  { %v393_v0 = vadd.f32 %v392_v63, %v378_v61  ;;  %v357_v1 = vadd.f32 %v356_v62, %v785_v26  ;;  %v385_v19 = vmul.f32 %v586_v45, %v586_v45  ;;  %vm407_vm0 = vcmask 1040384   ;;  %s430_s21 = sshll.u32 %s726_s2, 4  ;;  %s431_s21 = int_to_ptr.vmem [resolvable:$true] %s430_s21 }
 0x136   :  { %vm409_vm1 = vcmask 1041408   ;;  %s691_s22 = scalar_lea.vmem %s431_s21, 128  ;;  %p696_p11 = scmp.lt.s32.totalorder %s431_s21, %s431_s21 }
 0x137   :  { %v358_v4 = vadd.f32 %v777_v17, %v357_v1  ;;  %v394_v5 = vadd.f32 %v393_v0, %v379_v2  ;;  %p692_p10 = scmp.ne.s32.totalorder %s431_s21, %s691_s22  ;;  %p697_p12 = scmp.lt.s32.totalorder %s691_s22, %s691_s22 }
 0x139   :  { %v395_v7 = vadd.f32 %v394_v5, %v380_v3  ;;  %v359_v8 = vadd.f32 %v781_v21, %v358_v4  ;;  %p698_p13 = por %p697_p12, %p696_p11 }
 0x13b   :  { %v360_v10 = vadd.f32 %v359_v8, %v254_v40  ;;  %v396_v11 = vadd.f32 %v395_v7, %v381_v6  ;;  %p699_p0 = pnand %p698_p13, %p692_p10 }
 0x13d   :  { %v397_v12 = vadd.f32 %v396_v11, %v382_v9  ;;  %v361_v13 = vadd.f32 %v360_v10, %v257_v49 }
 0x13f   :  { %v362_v16 = vadd.f32 %v585_v38, %v361_v13  ;;  %v398_v18 = vadd.f32 %v397_v12, %v383_v14 }
 0x141   :  { %v363_v20 = vadd.f32 %v586_v45, %v362_v16  ;;  %v399_v22 = vadd.f32 %v398_v18, %v384_v15 }
 0x143   :  { %v364_v17 = vrot.slane %v363_v20, 4  ;;  %v400_v23 = vadd.f32 %v399_v22, %v385_v19 }
 0x145   :  { %v365_v24 = vadd.f32 %v364_v17, %v363_v20  ;;  %v401_v25 = vrot.slane %v400_v23, 4 }
 0x147   :  { %v366_v26 = vrot.slane %v365_v24, 2  ;;  %v402_v27 = vadd.f32 %v401_v25, %v400_v23 }
 0x149   :  { %v367_v28 = vadd.f32 %v366_v26, %v365_v24  ;;  %v403_v21 = vrot.slane %v402_v27, 2 }
 0x14b   :  { %v368_v29 = vrot.slane %v367_v28, 1  ;;  %v404_v30 = vadd.f32 %v403_v21, %v402_v27 }
 0x14d   :  { %v405_v31 = vrot.slane %v404_v30, 1  ;;  %v369_v32 = vadd.f32 %v368_v29, %v367_v28 }
 0x14f   :  { %v406_v33 = vadd.f32 %v405_v31, %v404_v30 }
 0x151   :  { %v408_v34 = vsel %vm407_vm0, %v369_v32, %v406_v33 }
 0x152   :  { %v410_v35 = vsel %vm409_vm1, %v408_v34, 0.0 }
 0x153   :  { %411 = vst [vmem:[#allocation8] sm:$0xff] %v410_v35 }
 0x154   :  { %702 = shalt.err (!%p699_p0)
}
 0x155   :  { %s703_s25 = scalar_lea.hbm %s831_s3, 128 }
 0x156   :  { %p704_p1 = scmp.ne.s32.totalorder %s831_s3, %s703_s25  ;;  %p707_p2 = scmp.lt.u32.totalorder %s703_s25, %s831_s3 }
 0x158   :  { %p709_p3 = pnand %p707_p2, %p704_p1 }
 0x15a   :  { %712 = shalt.err (!%p709_p3)
}
 0x15b   :  { %433 = dma.vmem_to_hbm [thread:$0]  %s431_s21, 128, %s831_s3, [#allocation9]  }
 0x15c   :  { %717 = dma.done.wait [#allocation4], 1024  }
 0x15d   :  { %718 = vsyncadd [#allocation4], 4294966272 }
 0x15e   :  { %719 = dma.done.wait [#allocation9], 128  }
 0x15f   :  { %720 = vsyncadd [#allocation9], 4294967168 }
 0x160   :  { %440 = vsyncpa [#allocation3], 1 }
 0x161   :  { %441 = vsyncpa [#allocation6], 1 }
 0x162   :  { %442 = vsyncpa [#allocation4], 1 }
 0x163   :  { %443 = vsyncpa [#allocation9], 1 }

</bundles_post_ra>
